<compile_context>
chip_gen: v7x
topology: tpu7x:2x2x1
jax: 0.10.0
libtpu: 0.0.40
codegen_flags: <defaults>
</compile_context>

<pallas_src>
import jax
import jax.numpy as jnp
from jax.experimental import pallas as pl
from jax.experimental.pallas import tpu as pltpu

_LANE = 128            # vreg lane width
_TILE_ROWS = 4096      # rows per grid step of the (rows, 128) layout
                       #   4096 * 128 * 4 B = 2 MiB per buffer; 2 streamed
                       #   arrays x 2 (double buffering) ~= 8 MiB of VMEM,
                       #   comfortably under every generation's scoped limit.
_VMEM_LIMIT_BYTES = 32 * 1024 * 1024   # explicit scoped-VMEM budget (all gens)
_PALLAS_MIN_BATCH = 1 << 20            # heuristic crossover vs fused XLA


def _exp_kernel(v_ref, o_ref):
    # Lane-dense elementwise exp: full 128-wide unmasked vld/vst, exp on the EUP.
    o_ref[...] = jnp.exp(v_ref[...])


def _exp_lane_dense_pallas(v2d):
    """exp() over an f32 (rows, 128) view.

    Ragged `rows` (not a multiple of the tile) is handled by Pallas boundary
    masking: the out-of-bounds part of the last input block may contain
    garbage (so exp of it may be inf/NaN), but those lanes are never written
    back to HBM -- no pre-padding or post-slicing passes are needed.
    """
    rows, lane = v2d.shape
    assert lane == _LANE and v2d.dtype == jnp.float32  # (8,128) f32 tiling assumed
    # Full-array block when small (always legal), else an (8,128)-aligned tile.
    tile_rows = rows if rows < _TILE_ROWS else _TILE_ROWS
    grid = pl.cdiv(rows, tile_rows)
    n = rows * _LANE
    return pl.pallas_call(
        _exp_kernel,
        out_shape=jax.ShapeDtypeStruct((rows, _LANE), v2d.dtype),
        grid=(grid,),
        in_specs=[pl.BlockSpec((tile_rows, _LANE), lambda i: (i, 0))],
        out_specs=pl.BlockSpec((tile_rows, _LANE), lambda i: (i, 0)),
        compiler_params=pltpu.CompilerParams(
            # Embarrassingly parallel batch axis -> shard across both
            # TensorCores on v7x; harmless on v5e/v6e (1 TC).
            dimension_semantics=("parallel",),
            vmem_limit_bytes=_VMEM_LIMIT_BYTES,
        ),
        cost_estimate=pl.CostEstimate(
            flops=0, transcendentals=n, bytes_accessed=2 * n * 4),
    )(v2d)


def direct_optimization_1d(means, variances, *, use_pallas=None):
    """Forward of DirectOptimization1D.

    means, variances: (B, 1) float32 parameters.
    returns: (B, 2) float32 == concat([means, exp(variances)], axis=1)
    """
    B = means.shape[0]
    assert means.shape == (B, 1) and variances.shape == (B, 1)
    m = means.reshape(B)
    v = variances.reshape(B)

    if use_pallas is None:
        # Below ~1M elements a single fused XLA exp+stack beats kernel launch
        # + per-step overhead; the Pallas path only pays off at large B.
        use_pallas = B >= _PALLAS_MIN_BATCH

    if (not use_pallas) or B < _LANE:
        exp_v = jnp.exp(v)
    else:
        main = (B // _LANE) * _LANE          # largest multiple of 128
        rows = main // _LANE
        exp_main = _exp_lane_dense_pallas(v[:main].reshape(rows, _LANE)).reshape(main)
        if main == B:
            exp_v = exp_main
        else:
            # <128-element ragged tail: tiny XLA op instead of padding/copying
            # the whole vector just to make it reshape to (rows, 128).
            exp_v = jnp.concatenate([exp_main, jnp.exp(v[main:])])

    # means pass-through + (B, 2) interleave (one fused XLA op).
    # TODO(synk): fold this interleave into the kernel as a lane-dense
    # (tile_rows, 256) output slab (means as a second input BlockSpec); deferred
    # because the required (T,128,2)->(T,256) lane-interleave shape-cast is not
    # a guaranteed Mosaic lowering, and a compile failure is worth less than
    # one extra fused XLA pass.
    return jnp.stack([m, exp_v], axis=1)


if __name__ == "__main__":
    key = jax.random.PRNGKey(0)
    k_m, k_v = jax.random.split(key)

    def make_params(batch_size):
        means = jax.random.uniform(k_m, (batch_size, 1), dtype=jnp.float32)
        variances = jax.random.uniform(k_v, (batch_size, 1), dtype=jnp.float32)
        return means, variances

    # 1) Small batch (multiple of 128), forced through the Pallas kernel.
    B0 = 1024
    means, variances = make_params(B0)
    out = jax.block_until_ready(
        direct_optimization_1d(means, variances, use_pallas=True))
    ref = jnp.concatenate([means, jnp.exp(variances)], axis=1)
    assert out.shape == (B0, 2)
    assert jnp.allclose(out, ref, atol=1e-6, rtol=1e-6)

    # 2) Ragged batch: 4 full 128-lane rows through the kernel + 3-elem XLA tail.
    B1 = 515
    means_r, variances_r = make_params(B1)
    out_r = jax.block_until_ready(
        direct_optimization_1d(means_r, variances_r, use_pallas=True))
    ref_r = jnp.concatenate([means_r, jnp.exp(variances_r)], axis=1)
    assert out_r.shape == (B1, 2)
    assert jnp.allclose(out_r, ref_r, atol=1e-6, rtol=1e-6)

    # 3) Default heuristic path (small batch -> fused XLA).
    out_h = jax.block_until_ready(direct_optimization_1d(means, variances))
    assert jnp.allclose(out_h, ref, atol=1e-6, rtol=1e-6)

    print("KERNEL_OK")
</pallas_src>

<mosaic_0001>
module attributes {stable_mosaic.version = 11 : i64} {
  func.func @_exp_kernel(%arg0: i32, %arg1: memref<8x128xf32, #tpu.memory_space<vmem>>, %arg2: memref<8x128xf32, #tpu.memory_space<vmem>>) attributes {dimension_semantics = [#tpu.dimension_semantics<parallel>], iteration_bounds = array<i64: 1>, scalar_prefetch = 0 : i64, scratch_operands = 0 : i64, tpu.core_type = #tpu.core_type<tc>, window_params = [{transform_indices = @transform_0, window_bounds = array<i64: 8, 128>}, {transform_indices = @transform_1, window_bounds = array<i64: 8, 128>}]} {
    %c0 = arith.constant 0 : index
    %c0_0 = arith.constant 0 : index
    %0 = vector.load %arg1[%c0, %c0_0] : memref<8x128xf32, #tpu.memory_space<vmem>>, vector<8x128xf32>
    %1 = math.exp %0 : vector<8x128xf32>
    %c0_1 = arith.constant 0 : index
    %c0_2 = arith.constant 0 : index
    %2 = vector.load %arg2[%c0_1, %c0_2] : memref<8x128xf32, #tpu.memory_space<vmem>>, vector<8x128xf32>
    tpu.vector_store %arg2[%c0_1, %c0_2], %1 {strides = array<i32>} : memref<8x128xf32, #tpu.memory_space<vmem>>, vector<8x128xf32>,
    return
  }
  func.func @transform_0(%arg0: i32) -> (i32, i32) {
    %c0_i32 = arith.constant 0 : i32
    %c0_i32_0 = arith.constant 0 : i32
    return %arg0, %c0_i32 : i32, i32
  }
  func.func @transform_1(%arg0: i32) -> (i32, i32) {
    %c0_i32 = arith.constant 0 : i32
    %c0_i32_0 = arith.constant 0 : i32
    return %arg0, %c0_i32 : i32, i32
  }
}

</mosaic_0001>

<bundles_post_ra>
// kernel: tpu_custom_call.1
= control target key start
LH: loop header
LB: loop body
LE: loop exit
PB: predicated region body
PF: predicated region fallthrough
CT: control target
= control target key end

     0   :  { %6 = vsyncpa [#allocation3], 0  ;;  %s128_s0 = inlined_call_operand.hbm [shape: f32[8,128], index: 0, kind: input, shape index: {}]   ;;  %s129_s1 = inlined_call_operand.hbm [shape: f32[8,128], index: 1, kind: output, shape index: {}]  }
   0x1   :  { %7 = vsyncpa [#allocation4], 0  ;;  %s92_s6 = smov [#allocation2]   ;;  %s44_s10 = scalar_lea.hbm %s128_s0, 128 }
   0x2   :  { %s14_s7 = sshll.u32 %s92_s6, 4  ;;  %p45_p0 = scmp.ne.s32.totalorder %s128_s0, %s44_s10  ;;  %s15_s7 = int_to_ptr.vmem [resolvable:$true] %s14_s7 }
   0x3   :  { %p48_p1 = scmp.lt.u32.totalorder %s44_s10, %s128_s0 }
   0x5   :  { %p50_p2 = pnand %p48_p1, %p45_p0 }
   0x7   :  { %53 = shalt.err (!%p50_p2)
}
   0x8   :  { %s54_s15 = scalar_lea.vmem %s15_s7, 128  ;;  %p59_p4 = scmp.lt.s32.totalorder %s15_s7, %s15_s7 }
   0x9   :  { %p55_p3 = scmp.ne.s32.totalorder %s15_s7, %s54_s15  ;;  %p60_p5 = scmp.lt.s32.totalorder %s54_s15, %s54_s15 }
   0xb   :  { %p61_p6 = por %p60_p5, %p59_p4 }
   0xd   :  { %p62_p7 = pnand %p61_p6, %p55_p3 }
   0xf   :  { %65 = shalt.err (!%p62_p7)
}
  0x10   :  { %17 = dma.hbm_to_vmem [thread:$0]  %s128_s0, 128, %s15_s7, [#allocation3]  }
  0x11   :  { %88 = dma.done.wait [#allocation3], 128  }
  0x12   :  { %89 = vsyncadd [#allocation3], 4294967168  ;;  %v21_v0 = vld [vmem:[#allocation2] sm:$0xff]  ;;  %s93_s18 = smov [#allocation5]  }
  0x13   :  { %v22_v1 = vmul.f32 1.442695, %v21_v0  ;;  %s31_s19 = sshll.u32 %s93_s18, 4  ;;  %s32_s19 = int_to_ptr.vmem [resolvable:$true] %s31_s19 }
  0x14   :  { %s66_s20 = scalar_lea.vmem %s32_s19, 128  ;;  %p71_p9 = scmp.lt.s32.totalorder %s32_s19, %s32_s19 }
  0x15   :  { %42 = vpow2.f32 %v22_v1  ;;  %p67_p8 = scmp.ne.s32.totalorder %s32_s19, %s66_s20  ;;  %p72_p10 = scmp.lt.s32.totalorder %s66_s20, %s66_s20 }
  0x17   :  { %p73_p11 = por %p72_p10, %p71_p9 }
  0x19   :  { %p74_p12 = pnand %p73_p11, %p67_p8 }
  0x1f   :  { %v43_v2 = vpop.eup %42 }
  0x20   :  { %24 = vst [vmem:[#allocation5] sm:$0xff] %v43_v2 }
  0x21   :  { %77 = shalt.err (!%p74_p12)
}
  0x22   :  { %s78_s0 = scalar_lea.hbm %s129_s1, 128 }
  0x23   :  { %p79_p13 = scmp.ne.s32.totalorder %s129_s1, %s78_s0  ;;  %p82_p0 = scmp.lt.u32.totalorder %s78_s0, %s129_s1 }
  0x25   :  { %p84_p1 = pnand %p82_p0, %p79_p13 }
  0x27   :  { %87 = shalt.err (!%p84_p1)
}
  0x28   :  { %34 = dma.vmem_to_hbm [thread:$0]  %s32_s19, 128, %s129_s1, [#allocation4]  }
  0x29   :  { %90 = dma.done.wait [#allocation4], 128  }
  0x2a   :  { %91 = vsyncadd [#allocation4], 4294967168 }
  0x2b   :  { %38 = vsyncpa [#allocation3], 1 }
  0x2c   :  { %39 = vsyncpa [#allocation4], 1 }

</bundles_post_ra>
